<compile_context>
chip_gen: v5e
topology: v5e:2x2
jax: 0.10.0
libtpu: 0.0.40
codegen_flags: <defaults>
</compile_context>

<pallas_src>
import jax
import jax.numpy as jnp
from jax.experimental import pallas as pl
from jax.experimental.pallas import tpu as pltpu

IN_F = 32                       # ifolded_width  (nn.Linear in_features)
OUT_F = 16                      # fold_ratio     (nn.Linear out_features)
FOLD = 256 // OUT_F             # 16 batch rows packed per 256-lane output row
FOLDED_IN = IN_F * FOLD         # 512  (multiple of 128 -> lane-dense loads)
FOLDED_OUT = OUT_F * FOLD       # 256  (multiple of 128 -> unmasked vst, full MXU width)

TILE_ROWS = 1024                # folded rows per grid step (== 16384 batch rows)
                                #   in : 1024*512*4 B = 2 MiB f32
                                #   out: 1024*256*4 B = 1 MiB f32
                                #   x2 double-buffered + 256 KiB weight ~ 6.25 MiB
                                #   << 16 MiB scoped VMEM (v5e) / 32 MiB (v6e, v7x)
GRIDLESS_MAX_ROWS = 512         # above this, always use >=2 grid steps (v7x megacore)


def folded_linear_relu_kernel(x_ref, w_ref, b_ref, o_ref):
    # x_ref: (rows, 512) f32   -- 16 batch rows of 32 features each, concatenated
    # w_ref: (512, 256) bf16   -- block-diagonal kron(I16, W^T), VMEM resident
    # b_ref: (1, 256)   f32    -- bias tiled 16x (hoisted broadcast)
    # o_ref: (rows, 256) f32   -- lane-dense output (unmasked stores)
    # In-kernel f32->bf16 pack: VPU work hidden under the input DMA, keeps HBM
    # traffic at 4 B/elem for x instead of 8 B/elem with a wrapper-side cast.
    x_bf = x_ref[...].astype(jnp.bfloat16)
    acc = jnp.dot(x_bf, w_ref[...], preferred_element_type=jnp.float32)
    o_ref[...] = jnp.maximum(acc + b_ref[...], 0.0)


def prepare_params(w_t, b):
    """Fold the tiny Linear params once (hoisted out of the per-call path).

    w_t: (32, 16) f32 (transposed torch weight), b: (16,) f32.
    Returns (wblk: (512, 256) bf16, bfold: (1, 256) f32)."""
    wblk = jnp.kron(jnp.eye(FOLD, dtype=jnp.float32),
                    w_t.astype(jnp.float32)).astype(jnp.bfloat16)
    bfold = jnp.tile(jnp.reshape(b, (-1,)).astype(jnp.float32),
                     (FOLD,)).reshape(1, FOLDED_OUT)
    return wblk, bfold


@jax.jit
def linear_relu(x, wblk, bfold):
    """x: (B, 32) f32 -> relu(x @ W^T + b): (B, 16) f32."""
    B = x.shape[0]

    # Pad only up to a whole folded row (<= FOLD-1 = 15 batch rows); never pad
    # up to a TILE_ROWS multiple -- the last grid block may be ragged instead.
    n_rows = pl.cdiv(B, FOLD)
    b_pad = n_rows * FOLD
    if b_pad != B:
        x = jnp.pad(x, ((0, b_pad - B), (0, 0)))
    xf = x.reshape(n_rows, FOLDED_IN)          # row-major contiguous: free view

    if n_rows <= GRIDLESS_MAX_ROWS:
        # Small batch: single invocation, everything VMEM resident (<= ~1.5 MiB).
        out = pl.pallas_call(
            folded_linear_relu_kernel,
            out_shape=jax.ShapeDtypeStruct((n_rows, FOLDED_OUT), jnp.float32),
            in_specs=[pl.BlockSpec(memory_space=pltpu.MemorySpace.VMEM)] * 3,
            out_specs=pl.BlockSpec(memory_space=pltpu.MemorySpace.VMEM),
        )(xf, wblk, bfold)
    else:
        # Gridded path: guarantee >= 2 grid steps (so v7x's 2nd TensorCore is
        # used) while capping the tile at TILE_ROWS; last block may be ragged.
        tile = min(TILE_ROWS, pl.cdiv(pl.cdiv(n_rows, 2), 8) * 8)
        grid = pl.cdiv(n_rows, tile)
        out = pl.pallas_call(
            folded_linear_relu_kernel,
            out_shape=jax.ShapeDtypeStruct((n_rows, FOLDED_OUT), jnp.float32),
            grid=(grid,),
            in_specs=[
                pl.BlockSpec((tile, FOLDED_IN), lambda i: (i, 0)),
                pl.BlockSpec((FOLDED_IN, FOLDED_OUT), lambda i: (0, 0)),  # resident
                pl.BlockSpec((1, FOLDED_OUT), lambda i: (0, 0)),          # resident
            ],
            out_specs=pl.BlockSpec((tile, FOLDED_OUT), lambda i: (i, 0)),
            compiler_params=pltpu.CompilerParams(
                dimension_semantics=("parallel",)),   # 2-TC sharding on v7x
        )(xf, wblk, bfold)

    # Lane-dense (n_rows, 256) f32 is row-major contiguous -> free view back to
    # (b_pad, 16); padded rows (relu(bias)) are dropped by the [:B] slice.
    return out.reshape(b_pad, OUT_F)[:B]


def init_params(key):
    # nn.Linear default init: U(-1/sqrt(fan_in), +1/sqrt(fan_in)).
    kw, kb = jax.random.split(key)
    bound = 1.0 / jnp.sqrt(jnp.float32(IN_F))
    # PyTorch weight is (out, in); store transposed (in, out) for x @ W^T.
    w = jax.random.uniform(kw, (OUT_F, IN_F), jnp.float32, minval=-bound, maxval=bound)
    b = jax.random.uniform(kb, (OUT_F,), jnp.float32, minval=-bound, maxval=bound)
    return w.T, b


def _check(x, w_t, b, out):
    # Tight check vs. the same bf16-quantized operands (validates kernel math),
    # loose check vs. full-f32 torch semantics (bf16 weight/activation quant).
    xq = x.astype(jnp.bfloat16).astype(jnp.float32)
    wq = w_t.astype(jnp.bfloat16).astype(jnp.float32)
    ref_q = jnp.maximum(xq @ wq + b, 0.0)
    ref_f32 = jnp.maximum(x @ w_t + b, 0.0)
    assert out.shape == ref_f32.shape
    assert jnp.allclose(out, ref_q, atol=1e-4, rtol=1e-4)
    assert jnp.allclose(out, ref_f32, atol=5e-2, rtol=5e-2)


if __name__ == "__main__":
    key = jax.random.PRNGKey(0)
    k_small, k_med, k_large, k_p = jax.random.split(key, 4)
    w_t, b = init_params(k_p)
    wblk, bfold = prepare_params(w_t, b)   # folded params built once, reused

    # Small case (grid-less path), shape consistent with the module: (batch, 32).
    x_small = jax.random.normal(k_small, (8, IN_F), jnp.float32)
    out_small = jax.block_until_ready(linear_relu(x_small, wblk, bfold))
    _check(x_small, w_t, b, out_small)

    # Medium batch: still grid-less (whole thing VMEM resident).
    x_med = jax.random.normal(k_med, (4096, IN_F), jnp.float32)
    out_med = jax.block_until_ready(linear_relu(x_med, wblk, bfold))
    _check(x_med, w_t, b, out_med)

    # Larger batch: gridded path with 2 parallel grid steps and a ragged last block.
    x_large = jax.random.normal(k_large, (16400, IN_F), jnp.float32)
    out_large = jax.block_until_ready(linear_relu(x_large, wblk, bfold))
    _check(x_large, w_t, b, out_large)

    print("KERNEL_OK")
</pallas_src>

<mosaic_0001>
module attributes {stable_mosaic.version = 11 : i64} {
  func.func @folded_linear_relu_kernel(%arg0: memref<1x512xf32, #tpu.memory_space<vmem>>, %arg1: memref<512x256xbf16, #tpu.memory_space<vmem>>, %arg2: memref<1x256xf32, #tpu.memory_space<vmem>>, %arg3: memref<1x256xf32, #tpu.memory_space<vmem>>) attributes {dimension_semantics = [], scalar_prefetch = 0 : i64, scratch_operands = 0 : i64, tpu.core_type = #tpu.core_type<tc>} {
    %c0 = arith.constant 0 : index
    %c0_0 = arith.constant 0 : index
    %0 = vector.load %arg0[%c0, %c0_0] : memref<1x512xf32, #tpu.memory_space<vmem>>, vector<1x512xf32>
    %1 = arith.truncf %0 : vector<1x512xf32> to vector<1x512xbf16>
    %c0_1 = arith.constant 0 : index
    %c0_2 = arith.constant 0 : index
    %2 = vector.load %arg1[%c0_1, %c0_2] : memref<512x256xbf16, #tpu.memory_space<vmem>>, vector<512x256xbf16>
    %cst = arith.constant dense<0.000000e+00> : vector<1x256xf32>
    %3 = tpu.matmul %1, %2, %cst {dimension_numbers = #tpu.dot_dimension_numbers<[1], [0], [0], [1], [0, 0, 1, 1], [], []>} : vector<1x512xbf16>, vector<512x256xbf16>, vector<1x256xf32> -> vector<1x256xf32>
    %c0_3 = arith.constant 0 : index
    %c0_4 = arith.constant 0 : index
    %4 = vector.load %arg2[%c0_3, %c0_4] : memref<1x256xf32, #tpu.memory_space<vmem>>, vector<1x256xf32>
    %5 = arith.addf %3, %4 : vector<1x256xf32>
    %cst_5 = arith.constant 0.000000e+00 : f32
    %6 = vector.broadcast %cst_5 : f32 to vector<1x256xf32>
    %7 = arith.maximumf %5, %6 : vector<1x256xf32>
    %c0_6 = arith.constant 0 : index
    %c0_7 = arith.constant 0 : index
    %8 = vector.load %arg3[%c0_6, %c0_7] : memref<1x256xf32, #tpu.memory_space<vmem>>, vector<1x256xf32>
    tpu.vector_store %arg3[%c0_6, %c0_7], %7 {strides = array<i32>} : memref<1x256xf32, #tpu.memory_space<vmem>>, vector<1x256xf32>,
    return
  }
}

</mosaic_0001>

<bundles_post_ra>
// kernel: linear_relu.1
= control target key start
LH: loop header
LB: loop body
LE: loop exit
PB: predicated region body
PF: predicated region fallthrough
CT: control target
= control target key end

     0   :  { %8 = vsyncpa [#allocation3], 0  ;;  %s905_s15 = smov [#allocation2]   ;;  %s906_s17 = smov 128   ;;  %s956_s0 = inlined_call_operand.vmem [shape: f32[1,512], index: 0, kind: input, shape index: {}]   ;;  %s957_s1 = inlined_call_operand.hbm [shape: bf16[512,256], index: 1, kind: input, shape index: {}]   ;;  %s958_s2 = inlined_call_operand.vmem [shape: f32[1,256], index: 2, kind: input, shape index: {}]   ;;  %s959_s3 = inlined_call_operand.vmem [shape: f32[1,256], index: 3, kind: output, shape index: {}]  }
   0x1   :  { %s15_s14 = sshll.u32 %s957_s1, 4  ;;  %s17_s16 = sshll.u32 %s905_s15, 4  ;;  %s16_s14 = int_to_ptr.hbm [resolvable:$true] %s15_s14  ;;  %s18_s16 = int_to_ptr.vmem [resolvable:$true] %s17_s16 }
   0x2   :  { %s907_s18 = smov 8  }
   0x3   :  { %23 = dma.hbm_to_vmem [thread:$0]  %s16_s14, 8192, %s18_s16, [#allocation3], %s906_s17, %s906_s17, %s907_s18  }
   0x4   :  { %903 = dma.done.wait [#allocation3], 8192  }
   0x5   :  { %904 = vsyncadd [#allocation3], 4294959104  ;;  %v614_v0 = vld [vmem:[#allocation2 + $0x70] sm:$0xf]  ;;  %v827_v1 = vld [vmem:[#allocation2 + $0x74] sm:$0xf0] }
   0x6   :  { %v678_v2 = vld [vmem:[#allocation2 + $0xf0] sm:$0xf]  ;;  %v615_v3 = vor.u32 %v827_v1, %v614_v0  ;;  %v843_v4 = vld [vmem:[#allocation2 + $0xf4] sm:$0xf0]  ;;  %v606_v11 = vld [vmem:[#allocation2 + $0x60] sm:$0xf] }
   0x7   :  { %v742_v5 = vld [vmem:[#allocation2 + $0x170] sm:$0xf]  ;;  %v859_v6 = vld [vmem:[#allocation2 + $0x174] sm:$0xf0]  ;;  %v679_v7 = vor.u32 %v843_v4, %v678_v2  ;;  %v825_v13 = vld [vmem:[#allocation2 + $0x64] sm:$0xf0] }
   0x8   :  { %v743_v8 = vor.u32 %v859_v6, %v742_v5  ;;  %v806_v9 = vld [vmem:[#allocation2 + $0x1f0] sm:$0xf]  ;;  %v875_v10 = vld [vmem:[#allocation2 + $0x1f4] sm:$0xf0]  ;;  %434 = vmatpush.bf16.msra.mxu0 %v615_v3  ;;  %v670_v14 = vld [vmem:[#allocation2 + $0xe0] sm:$0xf]  ;;  %v607_v16 = vor.u32 %v825_v13, %v606_v11 }
   0x9   :  { %v807_v12 = vor.u32 %v875_v10, %v806_v9  ;;  %v841_v15 = vld [vmem:[#allocation2 + $0xe4] sm:$0xf0]  ;;  %447 = vmatpush.bf16.msra.mxu1 %v679_v7  ;;  %v734_v18 = vld [vmem:[#allocation2 + $0x160] sm:$0xf]  ;;  %v598_v23 = vld [vmem:[#allocation2 + $0x50] sm:$0xf] }
   0xa   :  { %460 = vmatpush.bf16.msra.mxu2 %v743_v8  ;;  %v671_v17 = vor.u32 %v841_v15, %v670_v14  ;;  %v857_v19 = vld [vmem:[#allocation2 + $0x164] sm:$0xf0]  ;;  %v798_v20 = vld [vmem:[#allocation2 + $0x1e0] sm:$0xf]  ;;  %v823_v24 = vld [vmem:[#allocation2 + $0x54] sm:$0xf0] }
   0xb   :  { %473 = vmatpush.bf16.msra.mxu3 %v807_v12  ;;  %v735_v21 = vor.u32 %v857_v19, %v734_v18  ;;  %v873_v22 = vld [vmem:[#allocation2 + $0x1e4] sm:$0xf0]  ;;  %v662_v26 = vld [vmem:[#allocation2 + $0xd0] sm:$0xf]  ;;  %v839_v27 = vld [vmem:[#allocation2 + $0xd4] sm:$0xf0]  ;;  %v599_v29 = vor.u32 %v823_v24, %v598_v23 }
   0xc   :  { %v799_v25 = vor.u32 %v873_v22, %v798_v20  ;;  %v726_v28 = vld [vmem:[#allocation2 + $0x150] sm:$0xf]  ;;  %435 = vmatpush.bf16.msra.mxu0 %v607_v16  ;;  %v855_v30 = vld [vmem:[#allocation2 + $0x154] sm:$0xf0]  ;;  %v663_v33 = vor.u32 %v839_v27, %v662_v26  ;;  %v590_v35 = vld [vmem:[#allocation2 + $0x40] sm:$0xf] }
   0xd   :  { %v790_v31 = vld [vmem:[#allocation2 + $0x1d0] sm:$0xf]  ;;  %v871_v32 = vld [vmem:[#allocation2 + $0x1d4] sm:$0xf0]  ;;  %448 = vmatpush.bf16.msra.mxu1 %v671_v17  ;;  %v727_v34 = vor.u32 %v855_v30, %v726_v28  ;;  %v821_v36 = vld [vmem:[#allocation2 + $0x44] sm:$0xf0] }
   0xe   :  { %461 = vmatpush.bf16.msra.mxu2 %v735_v21  ;;  %v654_v37 = vld [vmem:[#allocation2 + $0xc0] sm:$0xf]  ;;  %v791_v38 = vor.u32 %v871_v32, %v790_v31  ;;  %v837_v39 = vld [vmem:[#allocation2 + $0xc4] sm:$0xf0]  ;;  %v591_v44 = vor.u32 %v821_v36, %v590_v35  ;;  %v582_v47 = vld [vmem:[#allocation2 + $0x30] sm:$0xf] }
   0xf   :  { %474 = vmatpush.bf16.msra.mxu3 %v799_v25  ;;  %v718_v40 = vld [vmem:[#allocation2 + $0x140] sm:$0xf]  ;;  %v853_v41 = vld [vmem:[#allocation2 + $0x144] sm:$0xf0]  ;;  %v655_v45 = vor.u32 %v837_v39, %v654_v37  ;;  %v819_v48 = vld [vmem:[#allocation2 + $0x34] sm:$0xf0] }
  0x10   :  { %v782_v42 = vld [vmem:[#allocation2 + $0x1c0] sm:$0xf]  ;;  %v869_v43 = vld [vmem:[#allocation2 + $0x1c4] sm:$0xf0]  ;;  %436 = vmatpush.bf16.msra.mxu0 %v599_v29  ;;  %v719_v46 = vor.u32 %v853_v41, %v718_v40  ;;  %v646_v49 = vld [vmem:[#allocation2 + $0xb0] sm:$0xf]  ;;  %v583_v56 = vor.u32 %v819_v48, %v582_v47 }
  0x11   :  { %449 = vmatpush.bf16.msra.mxu1 %v663_v33  ;;  %v783_v50 = vor.u32 %v869_v43, %v782_v42  ;;  %v835_v51 = vld [vmem:[#allocation2 + $0xb4] sm:$0xf0]  ;;  %v710_v52 = vld [vmem:[#allocation2 + $0x130] sm:$0xf]  ;;  %v574_v59 = vld [vmem:[#allocation2 + $0x20] sm:$0xf] }
  0x12   :  { %462 = vmatpush.bf16.msra.mxu2 %v727_v34  ;;  %v851_v53 = vld [vmem:[#allocation2 + $0x134] sm:$0xf0]  ;;  %v774_v54 = vld [vmem:[#allocation2 + $0x1b0] sm:$0xf]  ;;  %v647_v57 = vor.u32 %v835_v51, %v646_v49  ;;  %v817_v60 = vld [vmem:[#allocation2 + $0x24] sm:$0xf0] }
  0x13   :  { %475 = vmatpush.bf16.msra.mxu3 %v791_v38  ;;  %v867_v55 = vld [vmem:[#allocation2 + $0x1b4] sm:$0xf0]  ;;  %v711_v58 = vor.u32 %v851_v53, %v710_v52  ;;  %v638_v61 = vld [vmem:[#allocation2 + $0xa0] sm:$0xf]  ;;  %v833_v63 = vld [vmem:[#allocation2 + $0xa4] sm:$0xf0]  ;;  %v575_v4 = vor.u32 %v817_v60, %v574_v59 }
  0x14   :  { %437 = vmatpush.bf16.msra.mxu0 %v591_v44  ;;  %v775_v62 = vor.u32 %v867_v55, %v774_v54  ;;  %v702_v0 = vld [vmem:[#allocation2 + $0x120] sm:$0xf]  ;;  %v849_v1 = vld [vmem:[#allocation2 + $0x124] sm:$0xf0]  ;;  %v639_v5 = vor.u32 %v833_v63, %v638_v61  ;;  %v566_v7 = vld [vmem:[#allocation2 + $0x10] sm:$0xf] }
  0x15   :  { %450 = vmatpush.bf16.msra.mxu1 %v655_v45  ;;  %v766_v2 = vld [vmem:[#allocation2 + $0x1a0] sm:$0xf]  ;;  %v865_v3 = vld [vmem:[#allocation2 + $0x1a4] sm:$0xf0]  ;;  %v703_v6 = vor.u32 %v849_v1, %v702_v0  ;;  %v815_v8 = vld [vmem:[#allocation2 + $0x14] sm:$0xf0] }
  0x16   :  { %463 = vmatpush.bf16.msra.mxu2 %v719_v46  ;;  %v630_v9 = vld [vmem:[#allocation2 + $0x90] sm:$0xf]  ;;  %v767_v10 = vor.u32 %v865_v3, %v766_v2  ;;  %v831_v11 = vld [vmem:[#allocation2 + $0x94] sm:$0xf0]  ;;  %v558_v16 = vld [vmem:[#allocation2] sm:$0xf]  ;;  %v567_v17 = vor.u32 %v815_v8, %v566_v7 }
  0x17   :  { %476 = vmatpush.bf16.msra.mxu3 %v783_v50  ;;  %v694_v12 = vld [vmem:[#allocation2 + $0x110] sm:$0xf]  ;;  %v847_v13 = vld [vmem:[#allocation2 + $0x114] sm:$0xf0]  ;;  %v813_v18 = vld [vmem:[#allocation2 + $0x4] sm:$0xf0]  ;;  %v631_v21 = vor.u32 %v831_v11, %v630_v9 }
  0x18   :  { %438 = vmatpush.bf16.msra.mxu0 %v583_v56  ;;  %v758_v14 = vld [vmem:[#allocation2 + $0x190] sm:$0xf]  ;;  %v863_v15 = vld [vmem:[#allocation2 + $0x194] sm:$0xf0]  ;;  %v622_v19 = vld [vmem:[#allocation2 + $0x80] sm:$0xf]  ;;  %v695_v22 = vor.u32 %v847_v13, %v694_v12  ;;  %v559_v33 = vor.u32 %v813_v18, %v558_v16 }
  0x19   :  { %451 = vmatpush.bf16.msra.mxu1 %v647_v57  ;;  %v829_v20 = vld [vmem:[#allocation2 + $0x84] sm:$0xf0]  ;;  %v686_v23 = vld [vmem:[#allocation2 + $0x100] sm:$0xf]  ;;  %v759_v26 = vor.u32 %v863_v15, %v758_v14  ;;  %v826_v28 = vld [vmem:[#allocation2 + $0x74] sm:$0xf] }
  0x1a   :  { %464 = vmatpush.bf16.msra.mxu2 %v711_v58  ;;  %v845_v24 = vld [vmem:[#allocation2 + $0x104] sm:$0xf0]  ;;  %v750_v25 = vld [vmem:[#allocation2 + $0x180] sm:$0xf]  ;;  %v616_v29 = vld [vmem:[#allocation2 + $0x78] sm:$0xf0]  ;;  %v623_v37 = vor.u32 %v829_v20, %v622_v19 }
  0x1b   :  { %477 = vmatpush.bf16.msra.mxu3 %v775_v62  ;;  %v861_v27 = vld [vmem:[#allocation2 + $0x184] sm:$0xf0]  ;;  %v842_v30 = vld [vmem:[#allocation2 + $0xf4] sm:$0xf]  ;;  %v680_v31 = vld [vmem:[#allocation2 + $0xf8] sm:$0xf0]  ;;  %v687_v38 = vor.u32 %v845_v24, %v686_v23  ;;  %v619_v43 = vor.u32 %v826_v28, %v616_v29 }
  0x1c   :  { %439 = vmatpush.bf16.msra.mxu0 %v575_v4  ;;  %v30_v32 = vld [vmem:[%s956_s0] sm:$0xf]  ;;  %v858_v34 = vld [vmem:[#allocation2 + $0x174] sm:$0xf]  ;;  %v744_v35 = vld [vmem:[#allocation2 + $0x178] sm:$0xf0]  ;;  %v751_v42 = vor.u32 %v861_v27, %v750_v25  ;;  %v683_v45 = vor.u32 %v842_v30, %v680_v31 }
  0x1d   :  { %452 = vmatpush.bf16.msra.mxu1 %v639_v5  ;;  %v34_v36 = vperm.slane %v30_v32, 2  ;;  %v874_v39 = vld [vmem:[#allocation2 + $0x1f4] sm:$0xf]  ;;  %v808_v40 = vld [vmem:[#allocation2 + $0x1f8] sm:$0xf0]  ;;  %v32_v41 = vperm.slane %v30_v32, 0  ;;  %v747_v46 = vor.u32 %v858_v34, %v744_v35 }
  0x1e   :  { %465 = vmatpush.bf16.msra.mxu2 %v703_v6  ;;  %v824_v44 = vld [vmem:[#allocation2 + $0x64] sm:$0xf]  ;;  %v608_v47 = vld [vmem:[#allocation2 + $0x68] sm:$0xf0]  ;;  %v35_v49 = vperm.slane %v30_v32, 3  ;;  %v33_v50 = vperm.slane %v30_v32, 1  ;;  %v811_v51 = vor.u32 %v874_v39, %v808_v40 }
  0x1f   :  { %478 = vmatpush.bf16.msra.mxu3 %v767_v10  ;;  %v840_v48 = vld [vmem:[#allocation2 + $0xe4] sm:$0xf]  ;;  %v672_v52 = vld [vmem:[#allocation2 + $0xe8] sm:$0xf0]  ;;  %v934_v55 = vpack.c.bf16 %v34_v36, %v34_v36  ;;  %v936_v58 = vpack.c.bf16 %v32_v41, %v32_v41  ;;  %v611_v60 = vor.u32 %v824_v44, %v608_v47  ;;  %v822_v0 = vld [vmem:[#allocation2 + $0x54] sm:$0xf] }
  0x20   :  { %440 = vmatpush.bf16.msra.mxu0 %v567_v17  ;;  %v856_v53 = vld [vmem:[#allocation2 + $0x164] sm:$0xf]  ;;  %v736_v54 = vld [vmem:[#allocation2 + $0x168] sm:$0xf0]  ;;  %v938_v59 = vpack.c.bf16 %v35_v49, %v35_v49  ;;  %v940_v61 = vpack.c.bf16 %v33_v50, %v33_v50  ;;  %v675_v62 = vor.u32 %v840_v48, %v672_v52  ;;  %v600_v1 = vld [vmem:[#allocation2 + $0x58] sm:$0xf0] }
  0x21   :  { %453 = vmatpush.bf16.msra.mxu1 %v631_v21  ;;  %v872_v56 = vld [vmem:[#allocation2 + $0x1e4] sm:$0xf]  ;;  %v800_v57 = vld [vmem:[#allocation2 + $0x1e8] sm:$0xf0]  ;;  %v739_v63 = vor.u32 %v856_v53, %v736_v54  ;;  %v838_v2 = vld [vmem:[#allocation2 + $0xd4] sm:$0xf]  ;;  %v603_v9 = vor.u32 %v822_v0, %v600_v1 }
  0x22   :  { %466 = vmatpush.bf16.msra.mxu2 %v695_v22  ;;  %v803_v3 = vor.u32 %v872_v56, %v800_v57  ;;  %v664_v4 = vld [vmem:[#allocation2 + $0xd8] sm:$0xf0]  ;;  %v854_v5 = vld [vmem:[#allocation2 + $0x154] sm:$0xf]  ;;  %v820_v12 = vld [vmem:[#allocation2 + $0x44] sm:$0xf] }
  0x23   :  { %479 = vmatpush.bf16.msra.mxu3 %v759_v26  ;;  %v728_v6 = vld [vmem:[#allocation2 + $0x158] sm:$0xf0]  ;;  %v870_v7 = vld [vmem:[#allocation2 + $0x1d4] sm:$0xf]  ;;  %v667_v10 = vor.u32 %v838_v2, %v664_v4  ;;  %v592_v13 = vld [vmem:[#allocation2 + $0x48] sm:$0xf0] }
  0x24   :  { %441 = vmatpush.bf16.msra.mxu0 %v559_v33  ;;  %v792_v8 = vld [vmem:[#allocation2 + $0x1d8] sm:$0xf0]  ;;  %v731_v11 = vor.u32 %v854_v5, %v728_v6  ;;  %v836_v14 = vld [vmem:[#allocation2 + $0xc4] sm:$0xf]  ;;  %v656_v16 = vld [vmem:[#allocation2 + $0xc8] sm:$0xf0]  ;;  %v595_v21 = vor.u32 %v820_v12, %v592_v13 }
  0x25   :  { %454 = vmatpush.bf16.msra.mxu1 %v623_v37  ;;  %v795_v15 = vor.u32 %v870_v7, %v792_v8  ;;  %v852_v17 = vld [vmem:[#allocation2 + $0x144] sm:$0xf]  ;;  %v720_v18 = vld [vmem:[#allocation2 + $0x148] sm:$0xf0]  ;;  %v659_v22 = vor.u32 %v836_v14, %v656_v16  ;;  %v818_v24 = vld [vmem:[#allocation2 + $0x34] sm:$0xf] }
  0x26   :  { %467 = vmatpush.bf16.msra.mxu2 %v687_v38  ;;  %v868_v19 = vld [vmem:[#allocation2 + $0x1c4] sm:$0xf]  ;;  %v784_v20 = vld [vmem:[#allocation2 + $0x1c8] sm:$0xf0]  ;;  %v723_v23 = vor.u32 %v852_v17, %v720_v18  ;;  %v584_v25 = vld [vmem:[#allocation2 + $0x38] sm:$0xf0] }
  0x27   :  { %480 = vmatpush.bf16.msra.mxu3 %v751_v42  ;;  %442 = vmatmul.bf16.vlgmr.msra.gmra.mxu0 %v936_v58  ;;  %v834_v26 = vld [vmem:[#allocation2 + $0xb4] sm:$0xf]  ;;  %v787_v27 = vor.u32 %v868_v19, %v784_v20  ;;  %v648_v28 = vld [vmem:[#allocation2 + $0xb8] sm:$0xf0]  ;;  %v587_v33 = vor.u32 %v818_v24, %v584_v25  ;;  %v816_v36 = vld [vmem:[#allocation2 + $0x24] sm:$0xf] }
  0x28   :  { %486 = vmatpush.bf16.msrb.mxu0 %v619_v43  ;;  %455 = vmatmul.bf16.vlgmr.msra.gmra.mxu1 %v940_v61  ;;  %v850_v29 = vld [vmem:[#allocation2 + $0x134] sm:$0xf]  ;;  %v712_v30 = vld [vmem:[#allocation2 + $0x138] sm:$0xf0]  ;;  %v651_v34 = vor.u32 %v834_v26, %v648_v28  ;;  %v576_v37 = vld [vmem:[#allocation2 + $0x28] sm:$0xf0] }
  0x29   :  { %499 = vmatpush.bf16.msrb.mxu1 %v683_v45  ;;  %468 = vmatmul.bf16.vlgmr.msra.gmra.mxu2 %v934_v55  ;;  %v866_v31 = vld [vmem:[#allocation2 + $0x1b4] sm:$0xf]  ;;  %v776_v32 = vld [vmem:[#allocation2 + $0x1b8] sm:$0xf0]  ;;  %v715_v35 = vor.u32 %v850_v29, %v712_v30  ;;  %v832_v38 = vld [vmem:[#allocation2 + $0xa4] sm:$0xf]  ;;  %v579_v45 = vor.u32 %v816_v36, %v576_v37 }
  0x2a   :  { %512 = vmatpush.bf16.msrb.mxu2 %v747_v46  ;;  %481 = vmatmul.bf16.vlgmr.msra.gmra.mxu3 %v938_v59  ;;  %v779_v39 = vor.u32 %v866_v31, %v776_v32  ;;  %v640_v40 = vld [vmem:[#allocation2 + $0xa8] sm:$0xf0]  ;;  %v848_v41 = vld [vmem:[#allocation2 + $0x124] sm:$0xf]  ;;  %v814_v48 = vld [vmem:[#allocation2 + $0x14] sm:$0xf] }
  0x2b   :  { %525 = vmatpush.bf16.msrb.mxu3 %v811_v51  ;;  %v704_v42 = vld [vmem:[#allocation2 + $0x128] sm:$0xf0]  ;;  %v864_v43 = vld [vmem:[#allocation2 + $0x1a4] sm:$0xf]  ;;  %v643_v46 = vor.u32 %v832_v38, %v640_v40  ;;  %v568_v49 = vld [vmem:[#allocation2 + $0x18] sm:$0xf0] }
  0x2c   :  { %487 = vmatpush.bf16.msrb.mxu0 %v611_v60  ;;  %v768_v44 = vld [vmem:[#allocation2 + $0x1a8] sm:$0xf0]  ;;  %v707_v47 = vor.u32 %v848_v41, %v704_v42  ;;  %v830_v50 = vld [vmem:[#allocation2 + $0x94] sm:$0xf]  ;;  %v632_v52 = vld [vmem:[#allocation2 + $0x98] sm:$0xf0]  ;;  %v571_v60 = vor.u32 %v814_v48, %v568_v49 }
  0x2d   :  { %500 = vmatpush.bf16.msrb.mxu1 %v675_v62  ;;  %v771_v51 = vor.u32 %v864_v43, %v768_v44  ;;  %v846_v53 = vld [vmem:[#allocation2 + $0x114] sm:$0xf]  ;;  %v696_v54 = vld [vmem:[#allocation2 + $0x118] sm:$0xf0]  ;;  %v635_v62 = vor.u32 %v830_v50, %v632_v52  ;;  %v812_v0 = vld [vmem:[#allocation2 + $0x4] sm:$0xf] }
  0x2e   :  { %513 = vmatpush.bf16.msrb.mxu2 %v739_v63  ;;  %v862_v56 = vld [vmem:[#allocation2 + $0x194] sm:$0xf]  ;;  %v760_v57 = vld [vmem:[#allocation2 + $0x198] sm:$0xf0]  ;;  %v699_v63 = vor.u32 %v846_v53, %v696_v54  ;;  %v560_v1 = vld [vmem:[#allocation2 + $0x8] sm:$0xf0] }
  0x2f   :  { %526 = vmatpush.bf16.msrb.mxu3 %v803_v3  ;;  %v828_v2 = vld [vmem:[#allocation2 + $0x84] sm:$0xf]  ;;  %v763_v3 = vor.u32 %v862_v56, %v760_v57  ;;  %v624_v4 = vld [vmem:[#allocation2 + $0x88] sm:$0xf0]  ;;  %vm543_vm0 = vcmask 1040384  }
  0x30   :  { %488 = vmatpush.bf16.msrb.mxu0 %v603_v9  ;;  %v844_v5 = vld [vmem:[#allocation2 + $0x104] sm:$0xf]  ;;  %v688_v6 = vld [vmem:[#allocation2 + $0x108] sm:$0xf0]  ;;  %v563_v9 = vor.u32 %v812_v0, %v560_v1 }
  0x31   :  { %501 = vmatpush.bf16.msrb.mxu1 %v667_v10  ;;  %v860_v7 = vld [vmem:[#allocation2 + $0x184] sm:$0xf]  ;;  %v752_v8 = vld [vmem:[#allocation2 + $0x188] sm:$0xf0]  ;;  %v627_v10 = vor.u32 %v828_v2, %v624_v4 }
  0x32   :  { %514 = vmatpush.bf16.msrb.mxu2 %v731_v11  ;;  %v691_v11 = vor.u32 %v844_v5, %v688_v6  ;;  %v755_v12 = vor.u32 %v860_v7, %v752_v8 }
  0x33   :  { %527 = vmatpush.bf16.msrb.mxu3 %v795_v15 }
  0x34   :  { %489 = vmatpush.bf16.msrb.mxu0 %v595_v21  ;;  %v108_v21 = vld [vmem:[%s958_s2] sm:$0x3] }
  0x35   :  { %502 = vmatpush.bf16.msrb.mxu1 %v659_v22  ;;  %v430_v22 = vperm.slane %v108_v21, 0 }
  0x36   :  { %515 = vmatpush.bf16.msrb.mxu2 %v723_v23 }
  0x37   :  { %528 = vmatpush.bf16.msrb.mxu3 %v787_v27 }
  0x38   :  { %490 = vmatpush.bf16.msrb.mxu0 %v587_v33 }
  0x39   :  { %503 = vmatpush.bf16.msrb.mxu1 %v651_v34  ;;  %v546_v34 = vlaneseq }
  0x3a   :  { %516 = vmatpush.bf16.msrb.mxu2 %v715_v35 }
  0x3b   :  { %529 = vmatpush.bf16.msrb.mxu3 %v779_v39  ;;  %vm548_vm1 = vcmp.lt.s32.totalorder %v546_v34, 256 }
  0x3c   :  { %491 = vmatpush.bf16.msrb.mxu0 %v579_v45 }
  0x3d   :  { %504 = vmatpush.bf16.msrb.mxu1 %v643_v46 }
  0x3e   :  { %517 = vmatpush.bf16.msrb.mxu2 %v707_v47 }
  0x3f   :  { %530 = vmatpush.bf16.msrb.mxu3 %v771_v51 }
  0x40   :  { %492 = vmatpush.bf16.msrb.mxu0 %v571_v60 }
  0x41   :  { %505 = vmatpush.bf16.msrb.mxu1 %v635_v62 }
  0x42   :  { %518 = vmatpush.bf16.msrb.mxu2 %v699_v63 }
  0x43   :  { %531 = vmatpush.bf16.msrb.mxu3 %v763_v3 }
  0x44   :  { %493 = vmatpush.bf16.msrb.mxu0 %v563_v9 }
  0x45   :  { %506 = vmatpush.bf16.msrb.mxu1 %v627_v10 }
  0x46   :  { %519 = vmatpush.bf16.msrb.mxu2 %v691_v11 }
  0x47   :  { %532 = vmatpush.bf16.msrb.mxu3 %v755_v12  ;;  %494 = vmatmul.bf16.vlgmr.msrb.gmra.mxu0 %v936_v58  ;;  %v431_v58 = vperm.slane %v108_v21, 1 }
  0x48   :  { %507 = vmatmul.bf16.vlgmr.msrb.gmra.mxu1 %v940_v61 }
  0x49   :  { %520 = vmatmul.bf16.vlgmr.msrb.gmra.mxu2 %v934_v55 }
  0x4a   :  { %533 = vmatmul.bf16.vlgmr.msrb.gmra.mxu3 %v938_v59 }
  0xa4   :  { %v443_v13 = vpop.f32.mrf.mxu0 }
  0xa5   :  { %v456_v14 = vpop.f32.mrf.mxu1  ;;  %v444_v23 = vadd.f32 %v443_v13, %v430_v22 }
  0xa7   :  { %v457_v25 = vadd.f32 %v456_v14, %v444_v23 }
  0xac   :  { %v469_v15 = vpop.f32.mrf.mxu2  ;;  %v445_v17 = vpop.f32.mrf.mxu0 }
  0xad   :  { %v482_v16 = vpop.f32.mrf.mxu3  ;;  %v458_v18 = vpop.f32.mrf.mxu1  ;;  %v470_v26 = vadd.f32 %v469_v15, %v457_v25 }
  0xaf   :  { %v483_v32 = vadd.f32 %v482_v16, %v470_v26 }
  0xb1   :  { %v538_v36 = vmax.f32 %v483_v32, 0.0 }
  0xb4   :  { %v471_v19 = vpop.f32.mrf.mxu2 }
  0xb5   :  { %v484_v20 = vpop.f32.mrf.mxu3 }
  0xc4   :  { %v495_v61 = vpop.f32.mrf.mxu0 }
  0xc5   :  { %v496_v24 = vadd.f32 %v495_v61, %v431_v58  ;;  %v508_v55 = vpop.f32.mrf.mxu1 }
  0xc7   :  { %v509_v59 = vadd.f32 %v508_v55, %v496_v24 }
  0xcc   :  { %v521_v27 = vpop.f32.mrf.mxu2  ;;  %v497_v30 = vpop.f32.mrf.mxu0 }
  0xcd   :  { %v522_v28 = vadd.f32 %v521_v27, %v509_v59  ;;  %v534_v29 = vpop.f32.mrf.mxu3  ;;  %v510_v31 = vpop.f32.mrf.mxu1 }
  0xcf   :  { %v535_v33 = vadd.f32 %v534_v29, %v522_v28 }
  0xd1   :  { %v539_v35 = vmax.f32 %v535_v33, 0.0 }
  0xd3   :  { %v542_v37 = vrot.slane %v539_v35, 7 }
  0xd4   :  { %v523_v38 = vpop.f32.mrf.mxu2 }
  0xd5   :  { %v544_v39 = vsel %vm543_vm0, %v538_v36, %v542_v37  ;;  %v536_v40 = vpop.f32.mrf.mxu3 }
  0xd6   :  { %550 = vst.msk [vmem:[%s959_s3] sm:$0x3] %vm548_vm1, %v544_v39 }
  0xd7   :  { %555 = vsyncpa [#allocation3], 1 }

</bundles_post_ra>
